<compile_context>
chip_gen: v6e
topology: v6e:2x2x1
jax: 0.10.0
libtpu: 0.0.40
codegen_flags: <defaults>
</compile_context>

<pallas_src>
import jax
import jax.numpy as jnp
from jax.experimental import pallas as pl
from jax.experimental.pallas import tpu as pltpu


# Candidate lane-dense widths (wide last dim -> unmasked wide vector stores,
# few DMA descriptors).  All are multiples of 128.
_WIDTH_CANDIDATES = (8192, 4096, 2048, 1024, 512, 256, 128)

# Per-buffer block target (~4 MiB).  With double-buffered input + output that
# is ~16 MiB of VMEM, inside the 32 MiB scoped limit requested below.
_TARGET_BLOCK_BYTES = 4 * 1024 * 1024
_VMEM_LIMIT_BYTES = 32 * 1024 * 1024


def _identity_kernel(x_ref, o_ref):
    # Straight VMEM tile copy: out <- in.
    o_ref[...] = x_ref[...]


def _pallas_identity_2d(x2d):
    """x2d: (rows, width) with width a multiple of 128. Returns identical array."""
    rows, width = x2d.shape
    itemsize = jnp.dtype(x2d.dtype).itemsize

    # Rows per block: fill ~_TARGET_BLOCK_BYTES, rounded down to a multiple of
    # 32 sublanes (covers packing requirements for 32/16/8-bit dtypes).
    block_rows = max(32, (_TARGET_BLOCK_BYTES // (width * itemsize)) // 32 * 32)
    if rows <= block_rows:
        # Single block covering the whole array (full-extent dims are always
        # legal, even when not multiples of 8).
        block_rows = rows

    grid = (pl.cdiv(rows, block_rows),)
    return pl.pallas_call(
        _identity_kernel,
        out_shape=jax.ShapeDtypeStruct(x2d.shape, x2d.dtype),
        grid_spec=pltpu.PrefetchScalarGridSpec(
            num_scalar_prefetch=0,
            grid=grid,
            in_specs=[pl.BlockSpec((block_rows, width), lambda i: (i, 0))],
            out_specs=pl.BlockSpec((block_rows, width), lambda i: (i, 0)),
        ),
        compiler_params=pltpu.CompilerParams(
            dimension_semantics=("parallel",),
            vmem_limit_bytes=_VMEM_LIMIT_BYTES,
        ),
    )(x2d)


def back_hook_forward(*inputs):
    """JAX/Pallas equivalent of BackHook.forward(*inp) -> inp (identity)."""
    outs = []
    for x in inputs:
        n = x.size
        # Widest lane-dense width that exactly divides n (no pad/slice copies).
        width = next((w for w in _WIDTH_CANDIDATES if n >= w and n % w == 0), None)
        if n == 0 or width is None:
            # Zero-size or not 128-divisible: the forward is a semantic no-op,
            # so pass the tensor through untouched (exact identity, zero cost).
            outs.append(x)
            continue
        x2d = jnp.ravel(x).reshape(n // width, width)
        y2d = _pallas_identity_2d(x2d)
        outs.append(y2d.reshape(x.shape))
    return tuple(outs)


if __name__ == "__main__":
    key = jax.random.PRNGKey(0)
    k1, k2 = jax.random.split(key)

    # BackHook is layout agnostic; forward just returns its inputs.  Use an
    # NCHW activation and a small (batch, seq, hidden) tensor as examples.
    x = jax.random.normal(k1, (2, 4, 16, 16), dtype=jnp.float32)   # NCHW
    h = jax.random.normal(k2, (2, 8, 32), dtype=jnp.float32)       # (B, seq, hidden)

    out_x, out_h = back_hook_forward(x, h)
    jax.block_until_ready((out_x, out_h))

    assert out_x.shape == x.shape and out_x.dtype == x.dtype
    assert out_h.shape == h.shape and out_h.dtype == h.dtype
    assert bool(jnp.all(out_x == x)) and bool(jnp.all(out_h == h))

    print("KERNEL_OK")
</pallas_src>

<mosaic_0001>
module attributes {stable_mosaic.version = 11 : i64} {
  func.func @_identity_kernel(%arg0: i32, %arg1: memref<1x2048xf32, #tpu.memory_space<vmem>>, %arg2: memref<1x2048xf32, #tpu.memory_space<vmem>>) attributes {dimension_semantics = [#tpu.dimension_semantics<parallel>], iteration_bounds = array<i64: 1>, scalar_prefetch = 0 : i64, scratch_operands = 0 : i64, tpu.core_type = #tpu.core_type<tc>, window_params = [{transform_indices = @transform_0, window_bounds = array<i64: 1, 2048>}, {transform_indices = @transform_1, window_bounds = array<i64: 1, 2048>}]} {
    %c0 = arith.constant 0 : index
    %c0_0 = arith.constant 0 : index
    %0 = vector.load %arg1[%c0, %c0_0] : memref<1x2048xf32, #tpu.memory_space<vmem>>, vector<1x2048xf32>
    %c0_1 = arith.constant 0 : index
    %c0_2 = arith.constant 0 : index
    %1 = vector.load %arg2[%c0_1, %c0_2] : memref<1x2048xf32, #tpu.memory_space<vmem>>, vector<1x2048xf32>
    tpu.vector_store %arg2[%c0_1, %c0_2], %0 {strides = array<i32>} : memref<1x2048xf32, #tpu.memory_space<vmem>>, vector<1x2048xf32>,
    return
  }
  func.func @transform_0(%arg0: i32) -> (i32, i32) {
    %c0_i32 = arith.constant 0 : i32
    %c0_i32_0 = arith.constant 0 : i32
    return %arg0, %c0_i32 : i32, i32
  }
  func.func @transform_1(%arg0: i32) -> (i32, i32) {
    %c0_i32 = arith.constant 0 : i32
    %c0_i32_0 = arith.constant 0 : i32
    return %arg0, %c0_i32 : i32, i32
  }
}

</mosaic_0001>

<bundles_post_ra>
// kernel: tpu_custom_call.1
= control target key start
LH: loop header
LB: loop body
LE: loop exit
PB: predicated region body
PF: predicated region fallthrough
CT: control target
= control target key end

     0   :  { %6 = vsyncpa [#allocation3], 0  ;;  %s104_s0 = inlined_call_operand.hbm [shape: f32[1,2048], index: 0, kind: input, shape index: {}]   ;;  %s105_s1 = inlined_call_operand.hbm [shape: f32[1,2048], index: 1, kind: output, shape index: {}]  }
   0x1   :  { %7 = vsyncpa [#allocation4], 0  ;;  %s86_s6 = smov [#allocation2]  }
   0x2   :  { %s14_s7 = sshll.u32 %s86_s6, 4  ;;  %s15_s7 = int_to_ptr.vmem [resolvable:$true] %s14_s7 }
   0x3   :  { %s50_s8 = scalar_lea.vmem %s15_s7, 256  ;;  %p55_p1 = scmp.lt.s32.totalorder %s15_s7, %s15_s7 }
   0x4   :  { %p51_p0 = scmp.ne.s32.totalorder %s15_s7, %s50_s8  ;;  %p56_p2 = scmp.lt.s32.totalorder %s50_s8, %s50_s8 }
   0x6   :  { %p57_p3 = por %p56_p2, %p55_p1 }
   0x8   :  { %p58_p4 = pnand %p57_p3, %p51_p0 }
   0xa   :  { %61 = shalt.err (!%p58_p4)
}
   0xb   :  { %17 = dma.hbm_to_vmem [thread:$0]  %s104_s0, 256, %s15_s7, [#allocation3]  }
   0xc   :  { %82 = dma.done.wait [#allocation3], 256  }
   0xd   :  { %83 = vsyncadd [#allocation3], 4294967040  ;;  %s87_s11 = smov [#allocation5]   ;;  %v21_v0 = vld [vmem:[#allocation2] sm:$0xff]  ;;  %v22_v1 = vld [vmem:[#allocation2 + $0x8] sm:$0xff] }
   0xe   :  { %s31_s12 = sshll.u32 %s87_s11, 4  ;;  %23 = vst [vmem:[#allocation5] sm:$0xff] %v21_v0  ;;  %24 = vst [vmem:[#allocation5 + $0x8] sm:$0xff] %v22_v1  ;;  %s32_s12 = int_to_ptr.vmem [resolvable:$true] %s31_s12 }
   0xf   :  { %s62_s13 = scalar_lea.vmem %s32_s12, 256  ;;  %p67_p6 = scmp.lt.s32.totalorder %s32_s12, %s32_s12 }
  0x10   :  { %p63_p5 = scmp.ne.s32.totalorder %s32_s12, %s62_s13  ;;  %p68_p7 = scmp.lt.s32.totalorder %s62_s13, %s62_s13 }
  0x12   :  { %p69_p8 = por %p68_p7, %p67_p6 }
  0x14   :  { %p70_p9 = pnand %p69_p8, %p63_p5 }
  0x16   :  { %73 = shalt.err (!%p70_p9)
}
  0x17   :  { %34 = dma.vmem_to_hbm [thread:$0]  %s32_s12, 256, %s105_s1, [#allocation4]  }
  0x18   :  { %84 = dma.done.wait [#allocation4], 256  }
  0x19   :  { %85 = vsyncadd [#allocation4], 4294967040 }
  0x1a   :  { %38 = vsyncpa [#allocation3], 1 }
  0x1b   :  { %39 = vsyncpa [#allocation4], 1 }

</bundles_post_ra>
